<compile_context>
chip_gen: v7x
topology: tpu7x:2x2x1
jax: 0.10.0
libtpu: 0.0.40
codegen_flags: <defaults>
</compile_context>

<pallas_src>
import functools

import jax
import jax.numpy as jnp
import numpy as np
from jax.experimental import pallas as pl
from jax.experimental.pallas import tpu as pltpu


def _transition_b_kernel(x_ref, scale_ref, shift_ref, w_ref, o_ref, *, mxu_dtype):
    """One (batch, H-tile) block per grid step.

    x_ref     : (1, th, W, Cin)       input tile (NHWC)
    scale_ref : (1, Cin)              folded BN scale  = gamma / sqrt(var + eps)
    shift_ref : (1, Cin)              folded BN shift  = beta - mean * scale
    w_ref     : (Cin, Cout)           1x1 conv weight (x 0.25 pool factor folded in)
    o_ref     : (1, th//2, W//2, Cout) output tile (NHWC)
    """
    _, th, W, Cin = x_ref.shape
    _, tho, Wo, Cout = o_ref.shape

    # ---- folded BN + ReLU (all f32 on the VPU; lanes = channels) ----
    x = x_ref[0].reshape(th * W, Cin)                        # lane dim (Cin) untouched
    y = jnp.maximum(x * scale_ref[...] + shift_ref[...], 0.0)

    # ---- 2x2 / stride-2 *sum* pool (the 0.25 is folded into the conv weight) ----
    # All reshapes keep the minormost (channel/lane) dim intact -> cheap on TPU.
    # W-pool: rows h*W + 2j and h*W + 2j + 1 are adjacent spatial rows.
    y = y.reshape(th * Wo, 2, Cin)
    y = y[:, 0, :] + y[:, 1, :]                              # (th*Wo, Cin)
    # H-pool: group rows of each output row i = h//2 and add the two halves.
    y = y.reshape(tho, 2 * Wo, Cin)
    y = y[:, :Wo, :] + y[:, Wo:, :]                          # (tho, Wo, Cin)
    pooled = y.reshape(tho * Wo, Cin)

    # ---- 1x1 conv == channel matmul on the MXU (pool commuted in front: M = H*W/4) ----
    z = jnp.dot(pooled.astype(mxu_dtype), w_ref[...].astype(mxu_dtype),
                preferred_element_type=jnp.float32)          # (tho*Wo, Cout)

    o_ref[0] = z.reshape(tho, Wo, Cout).astype(o_ref.dtype)


def _pick_tile_h(H, W, Cin, Cout, itemsize=4, budget_bytes=16 * 1024 * 1024):
    """Largest even tile height dividing H whose double-buffered blocks fit the budget."""
    Wo = W // 2
    divisors = [t for t in range(2, H + 1, 2) if H % t == 0]

    def blocks_bytes(th):
        x_blk = th * W * Cin * itemsize
        o_blk = (th // 2) * Wo * Cout * itemsize
        w_blk = Cin * Cout * itemsize
        return 2 * (x_blk + o_blk + w_blk)       # double-buffered pipeline

    fitting = [t for t in divisors if blocks_bytes(t) <= budget_bytes]
    return max(fitting) if fitting else min(divisors)


@functools.partial(jax.jit, static_argnames=("eps", "mxu_dtype"))
def transition_b_forward(x_nchw, gamma, beta, run_mean, run_var, conv_w,
                         eps=1e-5, mxu_dtype=jnp.bfloat16):
    """x_nchw: (N, Cin, H, W) float32.  conv_w: (Cout, Cin) (1x1 kernel squeezed)."""
    N, Cin, H, W = x_nchw.shape
    Cout = conv_w.shape[0]
    assert H % 2 == 0 and W % 2 == 0, "2x2/stride-2 avg-pool needs even spatial dims"

    Ho, Wo = H // 2, W // 2
    th = _pick_tile_h(H, W, Cin, Cout)
    tho = th // 2

    # NCHW -> NHWC so channels sit in the lane dimension inside the kernel.
    x = jnp.transpose(x_nchw, (0, 2, 3, 1)).astype(jnp.float32)

    # Fold BN (running stats, inference mode) into a per-channel affine.
    scale = (gamma.astype(jnp.float32) / jnp.sqrt(run_var.astype(jnp.float32) + eps))
    shift = beta.astype(jnp.float32) - run_mean.astype(jnp.float32) * scale
    scale = scale.reshape(1, Cin)
    shift = shift.reshape(1, Cin)

    # 1x1 conv weight, transposed for (spatial, Cin) @ (Cin, Cout); fold in the 0.25
    # average-pool normalization (the kernel computes a sum-pool).
    w = (0.25 * conv_w.astype(jnp.float32)).T                # (Cin, Cout)

    kernel = functools.partial(_transition_b_kernel, mxu_dtype=mxu_dtype)

    out_nhwc = pl.pallas_call(
        kernel,
        out_shape=jax.ShapeDtypeStruct((N, Ho, Wo, Cout), jnp.float32),
        grid_spec=pltpu.PrefetchScalarGridSpec(
            num_scalar_prefetch=0,
            grid=(N, H // th),
            in_specs=[
                pl.BlockSpec((1, th, W, Cin), lambda n, h: (n, h, 0, 0)),
                pl.BlockSpec((1, Cin), lambda n, h: (0, 0)),
                pl.BlockSpec((1, Cin), lambda n, h: (0, 0)),
                pl.BlockSpec((Cin, Cout), lambda n, h: (0, 0)),
            ],
            out_specs=pl.BlockSpec((1, tho, Wo, Cout), lambda n, h: (n, h, 0, 0)),
        ),
        compiler_params=pltpu.CompilerParams(
            dimension_semantics=("parallel", "parallel"),
            vmem_limit_bytes=32 * 1024 * 1024,
        ),
    )(x, scale, shift, w)

    # NHWC -> NCHW to match PyTorch's output layout.
    return jnp.transpose(out_nhwc, (0, 3, 1, 2))


def _reference_forward(x_nchw, gamma, beta, run_mean, run_var, conv_w, eps=1e-5):
    """Pure-JAX reference: BatchNorm2d.eval -> relu -> 1x1 conv -> avgpool2x2."""
    scale = gamma / jnp.sqrt(run_var + eps)
    shift = beta - run_mean * scale
    y = x_nchw * scale[None, :, None, None] + shift[None, :, None, None]
    y = jnp.maximum(y, 0.0)
    z = jnp.einsum("nchw,oc->nohw", y, conv_w)               # 1x1 conv, no bias
    N, C, H, W = z.shape
    return z.reshape(N, C, H // 2, 2, W // 2, 2).mean(axis=(3, 5))


if __name__ == "__main__":
    # Small shapes consistent with the module: N=2, indepth=4, outdepth=8, 16x16 spatial.
    N, Cin, Cout, H, W = 2, 4, 8, 16, 16

    key = jax.random.PRNGKey(0)
    k_x, k_w, k_g, k_b, k_m, k_v = jax.random.split(key, 6)

    x = jax.random.normal(k_x, (N, Cin, H, W), dtype=jnp.float32)

    gamma = 1.0 + 0.1 * jax.random.normal(k_g, (Cin,), dtype=jnp.float32)
    beta = 0.1 * jax.random.normal(k_b, (Cin,), dtype=jnp.float32)
    run_mean = 0.1 * jax.random.normal(k_m, (Cin,), dtype=jnp.float32)
    run_var = jnp.abs(jax.random.normal(k_v, (Cin,), dtype=jnp.float32)) + 0.5
    conv_w = jax.random.normal(k_w, (Cout, Cin), dtype=jnp.float32) * (1.0 / np.sqrt(Cin))

    ref = _reference_forward(x, gamma, beta, run_mean, run_var, conv_w)

    # 1) Exact-parity path (f32 MXU operands).
    out_f32 = jax.block_until_ready(
        transition_b_forward(x, gamma, beta, run_mean, run_var, conv_w,
                             mxu_dtype=jnp.float32))
    np.testing.assert_allclose(np.asarray(out_f32), np.asarray(ref), rtol=1e-5, atol=1e-5)

    # 2) Default performance path (bf16 MXU operands, f32 accumulation) -> relaxed tolerance.
    out = jax.block_until_ready(
        transition_b_forward(x, gamma, beta, run_mean, run_var, conv_w))
    np.testing.assert_allclose(np.asarray(out), np.asarray(ref), rtol=2e-2, atol=2e-2)

    assert out.shape == (N, Cout, H // 2, W // 2)
    print("KERNEL_OK")
</pallas_src>

<mosaic_0001>
module attributes {stable_mosaic.version = 11 : i64} {
  func.func @_transition_b_kernel(%arg0: i32, %arg1: i32, %arg2: memref<1x16x16x4xf32, #tpu.memory_space<vmem>>, %arg3: memref<1x4xf32, #tpu.memory_space<vmem>>, %arg4: memref<1x4xf32, #tpu.memory_space<vmem>>, %arg5: memref<4x8xf32, #tpu.memory_space<vmem>>, %arg6: memref<1x8x8x8xf32, #tpu.memory_space<vmem>>) attributes {dimension_semantics = [#tpu.dimension_semantics<parallel>, #tpu.dimension_semantics<parallel>], iteration_bounds = array<i64: 2, 1>, scalar_prefetch = 0 : i64, scratch_operands = 0 : i64, tpu.core_type = #tpu.core_type<tc>, window_params = [{transform_indices = @transform_0, window_bounds = array<i64: 1, 16, 16, 4>}, {pipeline_mode = #tpu.pipeline_mode<synchronous>, transform_indices = @transform_1, window_bounds = array<i64: 1, 4>}, {pipeline_mode = #tpu.pipeline_mode<synchronous>, transform_indices = @transform_2, window_bounds = array<i64: 1, 4>}, {pipeline_mode = #tpu.pipeline_mode<synchronous>, transform_indices = @transform_3, window_bounds = array<i64: 4, 8>}, {transform_indices = @transform_4, window_bounds = array<i64: 1, 8, 8, 8>}]} {
    %c0 = arith.constant 0 : index
    %c0_0 = arith.constant 0 : index
    %c0_1 = arith.constant 0 : index
    %c0_2 = arith.constant 0 : index
    %0 = vector.load %arg2[%c0, %c0_0, %c0_1, %c0_2] : memref<1x16x16x4xf32, #tpu.memory_space<vmem>>, vector<1x16x16x4xf32>
    %1 = vector.shape_cast %0 : vector<1x16x16x4xf32> to vector<16x16x4xf32>
    %2 = vector.shape_cast %1 : vector<16x16x4xf32> to vector<256x4xf32>
    %c0_3 = arith.constant 0 : index
    %c0_4 = arith.constant 0 : index
    %3 = vector.load %arg3[%c0_3, %c0_4] : memref<1x4xf32, #tpu.memory_space<vmem>>, vector<1x4xf32>
    %4 = vector.broadcast %3 : vector<1x4xf32> to vector<256x4xf32>
    %5 = arith.mulf %2, %4 : vector<256x4xf32>
    %c0_5 = arith.constant 0 : index
    %c0_6 = arith.constant 0 : index
    %6 = vector.load %arg4[%c0_5, %c0_6] : memref<1x4xf32, #tpu.memory_space<vmem>>, vector<1x4xf32>
    %7 = vector.broadcast %6 : vector<1x4xf32> to vector<256x4xf32>
    %8 = arith.addf %5, %7 : vector<256x4xf32>
    %cst = arith.constant 0.000000e+00 : f32
    %9 = vector.broadcast %cst : f32 to vector<256x4xf32>
    %10 = arith.maximumf %8, %9 : vector<256x4xf32>
    %11 = vector.shape_cast %10 : vector<256x4xf32> to vector<128x2x4xf32>
    %12 = vector.extract_strided_slice %11 {offsets = [0, 0, 0], sizes = [128, 1, 4], strides = [1, 1, 1]} : vector<128x2x4xf32> to vector<128x1x4xf32>
    %13 = vector.shape_cast %12 : vector<128x1x4xf32> to vector<128x4xf32>
    %14 = vector.extract_strided_slice %11 {offsets = [0, 1, 0], sizes = [128, 1, 4], strides = [1, 1, 1]} : vector<128x2x4xf32> to vector<128x1x4xf32>
    %15 = vector.shape_cast %14 : vector<128x1x4xf32> to vector<128x4xf32>
    %16 = arith.addf %13, %15 : vector<128x4xf32>
    %17 = vector.shape_cast %16 : vector<128x4xf32> to vector<8x16x4xf32>
    %18 = vector.extract_strided_slice %17 {offsets = [0, 0, 0], sizes = [8, 8, 4], strides = [1, 1, 1]} : vector<8x16x4xf32> to vector<8x8x4xf32>
    %19 = vector.extract_strided_slice %17 {offsets = [0, 8, 0], sizes = [8, 8, 4], strides = [1, 1, 1]} : vector<8x16x4xf32> to vector<8x8x4xf32>
    %20 = arith.addf %18, %19 : vector<8x8x4xf32>
    %21 = vector.shape_cast %20 : vector<8x8x4xf32> to vector<64x4xf32>
    %c0_7 = arith.constant 0 : index
    %c0_8 = arith.constant 0 : index
    %22 = vector.load %arg5[%c0_7, %c0_8] : memref<4x8xf32, #tpu.memory_space<vmem>>, vector<4x8xf32>
    %cst_9 = arith.constant dense<0.000000e+00> : vector<64x8xf32>
    %23 = tpu.matmul %21, %22, %cst_9 {dimension_numbers = #tpu.dot_dimension_numbers<[1], [0], [0], [1], [0, 0, 1, 1], [], []>} : vector<64x4xf32>, vector<4x8xf32>, vector<64x8xf32> -> vector<64x8xf32>
    %24 = vector.shape_cast %23 : vector<64x8xf32> to vector<8x8x8xf32>
    %c0_10 = arith.constant 0 : index
    %c0_11 = arith.constant 0 : index
    %c0_12 = arith.constant 0 : index
    %c0_13 = arith.constant 0 : index
    %25 = vector.load %arg6[%c0_10, %c0_11, %c0_12, %c0_13] : memref<1x8x8x8xf32, #tpu.memory_space<vmem>>, vector<1x8x8x8xf32>
    %26 = vector.shape_cast %25 : vector<1x8x8x8xf32> to vector<8x8x8xf32>
    %27 = vector.shape_cast %24 : vector<8x8x8xf32> to vector<1x8x8x8xf32>
    tpu.vector_store %arg6[%c0_10, %c0_11, %c0_12, %c0_13], %27 {strides = array<i32>} : memref<1x8x8x8xf32, #tpu.memory_space<vmem>>, vector<1x8x8x8xf32>,
    return
  }
  func.func @transform_0(%arg0: i32, %arg1: i32) -> (i32, i32, i32, i32) {
    %c0_i32 = arith.constant 0 : i32
    %c0_i32_0 = arith.constant 0 : i32
    %c0_i32_1 = arith.constant 0 : i32
    return %arg0, %arg1, %c0_i32, %c0_i32_0 : i32, i32, i32, i32
  }
  func.func @transform_1(%arg0: i32, %arg1: i32) -> (i32, i32) {
    %c0_i32 = arith.constant 0 : i32
    %c0_i32_0 = arith.constant 0 : i32
    %c0_i32_1 = arith.constant 0 : i32
    return %c0_i32, %c0_i32_0 : i32, i32
  }
  func.func @transform_2(%arg0: i32, %arg1: i32) -> (i32, i32) {
    %c0_i32 = arith.constant 0 : i32
    %c0_i32_0 = arith.constant 0 : i32
    %c0_i32_1 = arith.constant 0 : i32
    return %c0_i32, %c0_i32_0 : i32, i32
  }
  func.func @transform_3(%arg0: i32, %arg1: i32) -> (i32, i32) {
    %c0_i32 = arith.constant 0 : i32
    %c0_i32_0 = arith.constant 0 : i32
    %c0_i32_1 = arith.constant 0 : i32
    return %c0_i32, %c0_i32_0 : i32, i32
  }
  func.func @transform_4(%arg0: i32, %arg1: i32) -> (i32, i32, i32, i32) {
    %c0_i32 = arith.constant 0 : i32
    %c0_i32_0 = arith.constant 0 : i32
    %c0_i32_1 = arith.constant 0 : i32
    return %arg0, %arg1, %c0_i32, %c0_i32_0 : i32, i32, i32, i32
  }
}

</mosaic_0001>

<bundles_post_ra>
// kernel: transition_b_forward.1
= control target key start
LH: loop header
LB: loop body
LE: loop exit
PB: predicated region body
PF: predicated region fallthrough
CT: control target
= control target key end

     0   :  { %s2525_s15 = smov 0   ;;  %s2527_s16 = smov 0   ;;  %s2947_s0 = inlined_call_operand.vmem [shape: f32[2,16,16,4], index: 0, kind: input, shape index: {}]   ;;  %s2948_s1 = inlined_call_operand.vmem [shape: f32[1,4], index: 1, kind: input, shape index: {}]   ;;  %s2949_s2 = inlined_call_operand.vmem [shape: f32[1,4], index: 2, kind: input, shape index: {}]   ;;  %s2950_s3 = inlined_call_operand.vmem [shape: f32[4,8], index: 3, kind: input, shape index: {}]   ;;  %s2951_s4 = inlined_call_operand.vmem [shape: f32[2,8,8,8], index: 4, kind: output, shape index: {}]  }
   0x1   :  { %s2529_s17 = smov 0  }
   0x2 LB: > { %s26_s18 = sadd.s32 1, %s2493_s16  ;;  %p2275_p0 = scmp.ge.s32.totalorder %s2497_s17, 1  ;;  %s2497_s17 = sphi %s2529_s17, %s14_s17   ;;  %s2493_s16 = sphi %s2527_s16, %s2953_s16   ;;  %s2489_s15 = sphi %s2525_s15, %s2952_s15  }
   0x3   : > { %p28_p1 = scmp.ge.s32.totalorder %s26_s18, 2  ;;  %p184_p2 = scmp.lt.s32.totalorder %s2497_s17, 3 }
   0x5   : > { %s2955_s18 = smov (%p28_p1, %s26_s18), 0  ;;  %p185_p3 = pnand %p2275_p0, %p184_p2 }
   0x6   : > { %v1662_v0 = vld [vmem:[%s2950_s3] sm:$0xf] (!%p185_p3)  ;;  %vm2063_vm0 = vcmask (!%p185_p3), 1043456   ;;  %p220_p4 = scmp.lt.s32.totalorder (!%p185_p3), %s2489_s15, 1  ;;  %v418_v1 = vlaneseq (!%p185_p3)  ;;  %v2499_v2 = vmov (!%p185_p3), 1983009808  }
   0x7   : > { %188 = sbr.rel (%p185_p3) target bundleno = 412 (0x19c), region = 36  ;;  %2432 = vmatprep.subr.msk.mxu0 (!%p185_p3), %vm2063_vm0, %v1662_v0  ;;  %2446 = vmatprep.subr.msk.mxu1 (!%p185_p3), %vm2063_vm0, %v1662_v0  ;;  %v416_v3 = vunpack.c.l.s4 (!%p185_p3), %v2499_v2  ;;  %v2552_v4 = vld [vmem:[%s2948_s1] ss:$0 sm:$0xff] (!%p185_p3)  ;;  %vm1983_vm1 = vcmask (!%p185_p3), 1041409   ;;  %vm1985_vm2 = vcmask (!%p185_p3), 1042434   ;;  %vm1987_vm3 = vcmask (!%p185_p3), 1043459  }
   0x8   : > { %2433 = vmatpush3.msk.msra.mxu0 (!%p185_p3), %vm2063_vm0, %v1662_v0  ;;  %2447 = vmatpush3.msk.msra.mxu1 (!%p185_p3), %vm2063_vm0, %v1662_v0  ;;  %v419_v6 = vshrl.u32 (!%p185_p3), %v418_v1, 7  ;;  %v2562_v7 = vld [vmem:[%s2949_s2] ss:$0 sm:$0xff] (!%p185_p3)  ;;  %vm1989_vm4 = vcmask (!%p185_p3), 1044484   ;;  %vm1991_vm5 = vcmask (!%p185_p3), 1045509   ;;  %vm1993_vm6 = vcmask (!%p185_p3), 1046534  }
   0x9   : > { %v417_v5 = vunpack.c.0.s8 (!%p185_p3), %v416_v3  ;;  %vm1995_vm7 = vcmask (!%p185_p3), 1047559   ;;  %vm2046_vm8 = vcmask (!%p185_p3), 31744   ;;  %vm2172_vm9 = vcmask (!%p185_p3), 64512  }
   0xa   : > { %v2571_v15 = vsub.s32 (!%p185_p3), 0, %v419_v6 }
   0xb   : > { %v2576_v19 = vsub.s32 (!%p185_p3), %v417_v5, %v419_v6 }
   0xe   : > { %s2957_s15 = smov (!%p220_p4, %s2489_s15), 1 }
   0xf   : > { %s2421_s21 = sshll.u32 %s2957_s15, 8  ;;  %s2422_s7 = sshll.u32 %s2957_s15, 6 }
  0x10   : > { %s2557_s26 = scalar_lea.vmem %s2947_s0, %s2421_s21  ;;  %s238_s10 = scalar_lea.vmem %s2951_s4, %s2422_s7 }
  0x11   : > { %v240_v8 = vld [vmem:[%s2557_s26] sm:$0xff]  ;;  %v241_v9 = vld [vmem:[%s2557_s26 + $0x8] sm:$0xff]  ;;  %v242_v10 = vld [vmem:[%s2557_s26 + $0x10] sm:$0xff] }
  0x12   : > { %v243_v11 = vld [vmem:[%s2557_s26 + $0x18] sm:$0xff]  ;;  %v279_v12 = vmul.f32 %v2552_v4, %v240_v8  ;;  %v280_v13 = vmul.f32 %v2552_v4, %v241_v9  ;;  %v281_v14 = vmul.f32 %v2552_v4, %v242_v10  ;;  %v256_v16 = vld [vmem:[%s2557_s26 + $0x80] sm:$0xff]  ;;  %v257_v17 = vld [vmem:[%s2557_s26 + $0x88] sm:$0xff] }
  0x13   : > { %v282_v18 = vmul.f32 %v2552_v4, %v243_v11  ;;  %v258_v20 = vld [vmem:[%s2557_s26 + $0x90] sm:$0xff]  ;;  %v259_v21 = vld [vmem:[%s2557_s26 + $0x98] sm:$0xff]  ;;  %v295_v22 = vmul.f32 %v2552_v4, %v256_v16  ;;  %v296_v23 = vmul.f32 %v2552_v4, %v257_v17 }
  0x14   : > { %v318_v24 = vadd.f32 %v2562_v7, %v279_v12  ;;  %v319_v25 = vadd.f32 %v2562_v7, %v280_v13  ;;  %v320_v26 = vadd.f32 %v2562_v7, %v281_v14  ;;  %v297_v27 = vmul.f32 %v2552_v4, %v258_v20 }
  0x15   : > { %v321_v28 = vadd.f32 %v2562_v7, %v282_v18  ;;  %v298_v29 = vmul.f32 %v2552_v4, %v259_v21  ;;  %v334_v30 = vadd.f32 %v2562_v7, %v295_v22  ;;  %v335_v31 = vadd.f32 %v2562_v7, %v296_v23 }
  0x16   : > { %v350_v32 = vmax.f32 %v318_v24, 0.0  ;;  %v351_v33 = vmax.f32 %v319_v25, 0.0  ;;  %v352_v34 = vmax.f32 %v320_v26, 0.0  ;;  %v2591_v35 = vadd.f32 %v2562_v7, %v297_v27 }
  0x17   : > { %v353_v36 = vmax.f32 %v321_v28, 0.0  ;;  %v2594_v37 = vadd.f32 %v2562_v7, %v298_v29  ;;  %v2596_v38 = vmax.f32 %v334_v30, 0.0  ;;  %v2598_v39 = vmax.f32 %v335_v31, 0.0 }
  0x18   : > { %v414_v40 = vcombine.high %v350_v32, %v350_v32  ;;  %v421_v41 = vrot.slane %v350_v32, %v2576_v19  ;;  %v431_v42 = vcombine.high %v351_v33, %v351_v33  ;;  %v438_v43 = vrot.slane %v351_v33, %v2576_v19 }
  0x19   : > { %v448_v44 = vcombine.high %v352_v34, %v352_v34  ;;  %v455_v45 = vrot.slane %v352_v34, %v2576_v19  ;;  %v465_v46 = vcombine.high %v353_v36, %v353_v36  ;;  %v472_v47 = vrot.slane %v353_v36, %v2576_v19 }
  0x1a   : > { %v428_v48 = vrot.slane %v414_v40, %v2576_v19  ;;  %v429_v49 = vcombine.high %v421_v41, %v421_v41  ;;  %v445_v50 = vrot.slane %v431_v42, %v2576_v19  ;;  %v446_v51 = vcombine.high %v438_v43, %v438_v43 }
  0x1b   : > { %v462_v52 = vrot.slane %v448_v44, %v2576_v19  ;;  %v463_v53 = vcombine.high %v455_v45, %v455_v45  ;;  %v479_v54 = vrot.slane %v465_v46, %v2576_v19  ;;  %v480_v55 = vcombine.high %v472_v47, %v472_v47 }
  0x1c   : > { %v430_v56 = vcombine.high %v428_v48, %v428_v48  ;;  %v447_v57 = vcombine.high %v445_v50, %v445_v50  ;;  %v2282_v58 = vrot.slane %v421_v41, 9  ;;  %v2283_v59 = vrot.slane %v429_v49, 9 }
  0x1d   : > { %v464_v60 = vcombine.high %v462_v52, %v462_v52  ;;  %v481_v61 = vcombine.high %v479_v54, %v479_v54  ;;  %v2284_v62 = vrot.slane %v428_v48, 9  ;;  %v2286_v63 = vrot.slane %v438_v43, 9 }
  0x1e   : > { %v2285_v0 = vrot.slane %v430_v56, 9  ;;  %v2287_v1 = vrot.slane %v446_v51, 9  ;;  %v2288_v2 = vrot.slane %v445_v50, 9  ;;  %v2289_v3 = vrot.slane %v447_v57, 9 }
  0x1f   : > { %v2290_v5 = vrot.slane %v455_v45, 9  ;;  %v2291_v6 = vrot.slane %v463_v53, 9  ;;  %v2292_v8 = vrot.slane %v462_v52, 9  ;;  %v2293_v9 = vrot.slane %v464_v60, 9 }
  0x20   : > { %v2294_v10 = vrot.slane %v472_v47, 9  ;;  %v2295_v11 = vrot.slane %v480_v55, 9  ;;  %v2296_v12 = vrot.slane %v479_v54, 9  ;;  %v2297_v13 = vrot.slane %v481_v61, 9 }
  0x21   : > { %v1470_v14 = vadd.f32 %v2282_v58, %v421_v41  ;;  %v1471_v16 = vadd.f32 %v2283_v59, %v429_v49  ;;  %v1472_v17 = vadd.f32 %v2284_v62, %v428_v48  ;;  %v1473_v18 = vadd.f32 %v2285_v0, %v430_v56 }
  0x22   : > { %v1474_v20 = vadd.f32 %v2286_v63, %v438_v43  ;;  %v1475_v21 = vadd.f32 %v2287_v1, %v446_v51  ;;  %v1476_v22 = vadd.f32 %v2288_v2, %v445_v50  ;;  %v1477_v23 = vadd.f32 %v2289_v3, %v447_v57 }
  0x23   : > { %v1478_v24 = vadd.f32 %v2290_v5, %v455_v45  ;;  %v1479_v25 = vadd.f32 %v2291_v6, %v463_v53  ;;  %v1480_v26 = vadd.f32 %v2292_v8, %v462_v52  ;;  %v1481_v27 = vadd.f32 %v2293_v9, %v464_v60 }
  0x24   : > { %v1482_v28 = vadd.f32 %v2294_v10, %v472_v47  ;;  %v1483_v29 = vadd.f32 %v2295_v11, %v480_v55  ;;  %v1484_v30 = vadd.f32 %v2296_v12, %v479_v54  ;;  %v1485_v31 = vadd.f32 %v2297_v13, %v481_v61 }
  0x25   : > { %v1598_v32 = vadd.f32 %v1478_v24, %v1470_v14  ;;  %v1599_v33 = vadd.f32 %v1479_v25, %v1471_v16  ;;  %v1600_v34 = vadd.f32 %v1480_v26, %v1472_v17  ;;  %v1601_v36 = vadd.f32 %v1481_v27, %v1473_v18 }
  0x26   : > { %v1602_v40 = vadd.f32 %v1482_v28, %v1474_v20  ;;  %v1603_v41 = vadd.f32 %v1483_v29, %v1475_v21  ;;  %v1604_v42 = vadd.f32 %v1484_v30, %v1476_v22  ;;  %v1605_v43 = vadd.f32 %v1485_v31, %v1477_v23 }
  0x27   : > { %v1730_v44 = vrot.slane %v1598_v32, %v2571_v15  ;;  %v1734_v45 = vrot.slane %v1599_v33, %v2571_v15  ;;  %v1738_v46 = vrot.slane %v1600_v34, %v2571_v15  ;;  %v1742_v47 = vrot.slane %v1601_v36, %v2571_v15 }
  0x28   : > { %v1746_v48 = vrot.slane %v1602_v40, %v2571_v15  ;;  %v1750_v49 = vrot.slane %v1603_v41, %v2571_v15  ;;  %v1754_v50 = vrot.slane %v1604_v42, %v2571_v15  ;;  %v1758_v51 = vrot.slane %v1605_v43, %v2571_v15 }
  0x29   : > { %v1984_v52 = vsel %vm1983_vm1, %v1734_v45, %v1730_v44  ;;  %v368_v53 = vmax.f32 %v2591_v35, 0.0  ;;  %v369_v54 = vmax.f32 %v2594_v37, 0.0  ;;  %v686_v55 = vcombine.high %v2596_v38, %v2596_v38 }
  0x2a   : > { %v1986_v56 = vsel %vm1985_vm2, %v1738_v46, %v1984_v52  ;;  %v693_v57 = vrot.slane %v2596_v38, %v2576_v19  ;;  %v703_v58 = vcombine.high %v2598_v39, %v2598_v39  ;;  %v710_v59 = vrot.slane %v2598_v39, %v2576_v19 }
  0x2b   : > { %v1988_v60 = vsel %vm1987_vm3, %v1742_v47, %v1986_v56  ;;  %v700_v35 = vrot.slane %v686_v55, %v2576_v19  ;;  %v720_v61 = vcombine.high %v368_v53, %v368_v53  ;;  %v727_v37 = vrot.slane %v368_v53, %v2576_v19 }
  0x2c   : > { %v1990_v62 = vsel %vm1989_vm4, %v1746_v48, %v1988_v60  ;;  %v701_v63 = vcombine.high %v693_v57, %v693_v57  ;;  %v717_v0 = vrot.slane %v703_v58, %v2576_v19  ;;  %v718_v1 = vcombine.high %v710_v59, %v710_v59  ;;  %v244_v60 = vld [vmem:[%s2557_s26 + $0x20] sm:$0xff] }
  0x2d   : > { %v1992_v38 = vsel %vm1991_vm5, %v1750_v49, %v1990_v62  ;;  %v702_v2 = vcombine.high %v700_v35, %v700_v35  ;;  %v734_v3 = vrot.slane %v720_v61, %v2576_v19  ;;  %v735_v5 = vcombine.high %v727_v37, %v727_v37 }
  0x2e   : > { %v1994_v39 = vsel %vm1993_vm6, %v1754_v50, %v1992_v38  ;;  %v719_v6 = vcombine.high %v717_v0, %v717_v0  ;;  %v737_v8 = vcombine.high %v369_v54, %v369_v54  ;;  %v744_v9 = vrot.slane %v369_v54, %v2576_v19  ;;  %v260_v38 = vld [vmem:[%s2557_s26 + $0xa0] sm:$0xff] }
  0x2f   : > { %v1996_v10 = vsel %vm1995_vm7, %v1758_v51, %v1994_v39  ;;  %v736_v11 = vcombine.high %v734_v3, %v734_v3  ;;  %v2346_v12 = vrot.slane %v693_v57, 9  ;;  %v2347_v13 = vrot.slane %v701_v63, 9 }
  0x30   : > { %2434 = vmatprep.mubr.msk.f32.mxu0 %vm2046_vm8, %v1996_v10  ;;  %v751_v14 = vrot.slane %v737_v8, %v2576_v19  ;;  %v752_v16 = vcombine.high %v744_v9, %v744_v9  ;;  %v2348_v17 = vrot.slane %v700_v35, 9  ;;  %v2349_v18 = vrot.slane %v702_v2, 9 }
  0x31   : > { %v2350_v20 = vrot.slane %v710_v59, 9  ;;  %v2351_v21 = vrot.slane %v718_v1, 9  ;;  %v2352_v22 = vrot.slane %v717_v0, 9  ;;  %v2353_v23 = vrot.slane %v719_v6, 9 }
  0x32   : > { %v753_v24 = vcombine.high %v751_v14, %v751_v14  ;;  %v2354_v25 = vrot.slane %v727_v37, 9  ;;  %v2355_v26 = vrot.slane %v735_v5, 9  ;;  %v2356_v27 = vrot.slane %v734_v3, 9 }
  0x33   : > { %v2357_v28 = vrot.slane %v736_v11, 9  ;;  %v2358_v29 = vrot.slane %v744_v9, 9  ;;  %v2359_v30 = vrot.slane %v752_v16, 9  ;;  %v2360_v31 = vrot.slane %v751_v14, 9 }
  0x34   : > { %v2361_v32 = vrot.slane %v753_v24, 9  ;;  %v1534_v33 = vadd.f32 %v2346_v12, %v693_v57  ;;  %v1535_v34 = vadd.f32 %v2347_v13, %v701_v63  ;;  %v1536_v36 = vadd.f32 %v2348_v17, %v700_v35  ;;  %v245_v35 = vld [vmem:[%s2557_s26 + $0x28] sm:$0xff]  ;;  %v262_v12 = vld [vmem:[%s2557_s26 + $0xb0] sm:$0xff]  ;;  %v263_v17 = vld [vmem:[%s2557_s26 + $0xb8] sm:$0xff] }
  0x35   : > { %v1537_v40 = vadd.f32 %v2349_v18, %v702_v2  ;;  %v1538_v41 = vadd.f32 %v2350_v20, %v710_v59  ;;  %v1539_v42 = vadd.f32 %v2351_v21, %v718_v1  ;;  %v1540_v43 = vadd.f32 %v2352_v22, %v717_v0  ;;  %v246_v0 = vld [vmem:[%s2557_s26 + $0x30] sm:$0xff]  ;;  %v247_v1 = vld [vmem:[%s2557_s26 + $0x38] sm:$0xff] }
  0x36   : > { %v1541_v44 = vadd.f32 %v2353_v23, %v719_v6  ;;  %v1542_v45 = vadd.f32 %v2354_v25, %v727_v37  ;;  %v1543_v46 = vadd.f32 %v2355_v26, %v735_v5  ;;  %v1544_v47 = vadd.f32 %v2356_v27, %v734_v3  ;;  %v261_v6 = vld [vmem:[%s2557_s26 + $0xa8] sm:$0xff] }
  0x37   : > { %v1545_v48 = vadd.f32 %v2357_v28, %v736_v11  ;;  %v1546_v49 = vadd.f32 %v2358_v29, %v744_v9  ;;  %v1547_v50 = vadd.f32 %v2359_v30, %v752_v16  ;;  %v1548_v51 = vadd.f32 %v2360_v31, %v751_v14 }
  0x38   : > { %v1549_v52 = vadd.f32 %v2361_v32, %v753_v24  ;;  %v1630_v53 = vadd.f32 %v1542_v45, %v1534_v33  ;;  %v1631_v54 = vadd.f32 %v1543_v46, %v1535_v34  ;;  %v1632_v55 = vadd.f32 %v1544_v47, %v1536_v36 }
  0x39   : > { %v1633_v56 = vadd.f32 %v1545_v48, %v1537_v40  ;;  %v1634_v57 = vadd.f32 %v1546_v49, %v1538_v41  ;;  %v1635_v58 = vadd.f32 %v1547_v50, %v1539_v42  ;;  %v1636_v59 = vadd.f32 %v1548_v51, %v1540_v43 }
  0x3a   : > { %v1637_v61 = vadd.f32 %v1549_v52, %v1541_v44  ;;  %v1858_v37 = vrot.slane %v1630_v53, %v2571_v15  ;;  %v1862_v62 = vrot.slane %v1631_v54, %v2571_v15  ;;  %v1866_v63 = vrot.slane %v1632_v55, %v2571_v15 }
  0x3b   : > { %v1870_v2 = vrot.slane %v1633_v56, %v2571_v15  ;;  %v1874_v3 = vrot.slane %v1634_v57, %v2571_v15  ;;  %v1878_v5 = vrot.slane %v1635_v58, %v2571_v15  ;;  %v1882_v39 = vrot.slane %v1636_v59, %v2571_v15 }
  0x3c   : > { %v1886_v8 = vrot.slane %v1637_v61, %v2571_v15  ;;  %v2018_v9 = vsel %vm1983_vm1, %v1862_v62, %v1858_v37  ;;  %v283_v10 = vmul.f32 %v2552_v4, %v244_v60  ;;  %v284_v11 = vmul.f32 %v2552_v4, %v245_v35 }
  0x3d   : > { %v2019_v13 = vsel %vm1985_vm2, %v1866_v63, %v2018_v9  ;;  %v285_v14 = vmul.f32 %v2552_v4, %v246_v0  ;;  %v286_v16 = vmul.f32 %v2552_v4, %v247_v1  ;;  %v299_v18 = vmul.f32 %v2552_v4, %v260_v38 }
  0x3e   : > { %v2020_v20 = vsel %vm1987_vm3, %v1870_v2, %v2019_v13  ;;  %v322_v21 = vadd.f32 %v2562_v7, %v283_v10  ;;  %v323_v22 = vadd.f32 %v2562_v7, %v284_v11  ;;  %v2667_v23 = vmul.f32 %v2552_v4, %v261_v6 }
  0x3f   : > { %v2021_v24 = vsel %vm1989_vm4, %v1874_v3, %v2020_v20  ;;  %v324_v25 = vadd.f32 %v2562_v7, %v285_v14  ;;  %v325_v26 = vadd.f32 %v2562_v7, %v286_v16  ;;  %v2673_v27 = vmul.f32 %v2552_v4, %v262_v12 }
  0x40   : > { %v2022_v28 = vsel %vm1991_vm5, %v1878_v5, %v2021_v24  ;;  %v354_v29 = vmax.f32 %v322_v21, 0.0  ;;  %v355_v30 = vmax.f32 %v323_v22, 0.0  ;;  %v2677_v31 = vmul.f32 %v2552_v4, %v263_v17 }
  0x41   : > { %v2023_v32 = vsel %vm1993_vm6, %v1882_v39, %v2022_v28  ;;  %v356_v33 = vmax.f32 %v324_v25, 0.0  ;;  %v357_v34 = vmax.f32 %v325_v26, 0.0  ;;  %v2681_v36 = vadd.f32 %v2562_v7, %v299_v18 }
  0x42   : > { %v2024_v40 = vsel %vm1995_vm7, %v1886_v8, %v2023_v32  ;;  %v482_v41 = vcombine.high %v354_v29, %v354_v29  ;;  %v489_v42 = vrot.slane %v354_v29, %v2576_v19  ;;  %v499_v43 = vcombine.high %v355_v30, %v355_v30 }
  0x43   : > { %2440 = vmatprep.mubr.msk.f32.mxu1 %vm2046_vm8, %v2024_v40  ;;  %v506_v44 = vrot.slane %v355_v30, %v2576_v19  ;;  %v516_v45 = vcombine.high %v356_v33, %v356_v33  ;;  %v523_v46 = vrot.slane %v356_v33, %v2576_v19  ;;  %v533_v47 = vcombine.high %v357_v34, %v357_v34 }
  0x44   : > { %v496_v48 = vrot.slane %v482_v41, %v2576_v19  ;;  %v497_v49 = vcombine.high %v489_v42, %v489_v42  ;;  %v513_v50 = vrot.slane %v499_v43, %v2576_v19  ;;  %v540_v51 = vrot.slane %v357_v34, %v2576_v19 }
  0x45   : > { %v514_v52 = vcombine.high %v506_v44, %v506_v44  ;;  %v530_v53 = vrot.slane %v516_v45, %v2576_v19  ;;  %v531_v54 = vcombine.high %v523_v46, %v523_v46  ;;  %v547_v55 = vrot.slane %v533_v47, %v2576_v19 }
  0x46   : > { %v498_v56 = vcombine.high %v496_v48, %v496_v48  ;;  %v515_v57 = vcombine.high %v513_v50, %v513_v50  ;;  %v548_v58 = vcombine.high %v540_v51, %v540_v51  ;;  %v2298_v59 = vrot.slane %v489_v42, 9 }
  0x47   : > { %v532_v60 = vcombine.high %v530_v53, %v530_v53  ;;  %v549_v35 = vcombine.high %v547_v55, %v547_v55  ;;  %v2299_v61 = vrot.slane %v497_v49, 9  ;;  %v2300_v37 = vrot.slane %v496_v48, 9 }
  0x48   : > { %v2301_v62 = vrot.slane %v498_v56, 9  ;;  %v2302_v63 = vrot.slane %v506_v44, 9  ;;  %v2303_v0 = vrot.slane %v514_v52, 9  ;;  %v2304_v1 = vrot.slane %v513_v50, 9 }
  0x49   : > { %v2305_v38 = vrot.slane %v515_v57, 9  ;;  %v2306_v2 = vrot.slane %v523_v46, 9  ;;  %v2307_v3 = vrot.slane %v531_v54, 9  ;;  %v2308_v5 = vrot.slane %v530_v53, 9 }
  0x4a   : > { %v2309_v39 = vrot.slane %v532_v60, 9  ;;  %v2310_v6 = vrot.slane %v540_v51, 9  ;;  %v2311_v8 = vrot.slane %v548_v58, 9  ;;  %v2312_v9 = vrot.slane %v547_v55, 9 }
  0x4b   : > { %v2313_v10 = vrot.slane %v549_v35, 9  ;;  %v1486_v11 = vadd.f32 %v2298_v59, %v489_v42  ;;  %v1487_v12 = vadd.f32 %v2299_v61, %v497_v49  ;;  %v1488_v13 = vadd.f32 %v2300_v37, %v496_v48  ;;  %v248_v48 = vld [vmem:[%s2557_s26 + $0x40] sm:$0xff] }
  0x4c   : > { %v1489_v14 = vadd.f32 %v2301_v62, %v498_v56  ;;  %v1490_v16 = vadd.f32 %v2302_v63, %v506_v44  ;;  %v1491_v17 = vadd.f32 %v2303_v0, %v514_v52  ;;  %v1492_v18 = vadd.f32 %v2304_v1, %v513_v50 }
  0x4d   : > { %v1493_v20 = vadd.f32 %v2305_v38, %v515_v57  ;;  %v1494_v21 = vadd.f32 %v2306_v2, %v523_v46  ;;  %v1495_v22 = vadd.f32 %v2307_v3, %v531_v54  ;;  %v1496_v24 = vadd.f32 %v2308_v5, %v530_v53  ;;  %v249_v53 = vld [vmem:[%s2557_s26 + $0x48] sm:$0xff] }
  0x4e   : > { %v1497_v25 = vadd.f32 %v2309_v39, %v532_v60  ;;  %v1498_v26 = vadd.f32 %v2310_v6, %v540_v51  ;;  %v1499_v28 = vadd.f32 %v2311_v8, %v548_v58  ;;  %v1500_v29 = vadd.f32 %v2312_v9, %v547_v55 }
  0x4f   : > { %v1501_v30 = vadd.f32 %v2313_v10, %v549_v35  ;;  %v1606_v32 = vadd.f32 %v1494_v21, %v1486_v11  ;;  %v1607_v33 = vadd.f32 %v1495_v22, %v1487_v12  ;;  %v1608_v34 = vadd.f32 %v1496_v24, %v1488_v13 }
  0x50   : > { %v1609_v40 = vadd.f32 %v1497_v25, %v1489_v14  ;;  %v1610_v41 = vadd.f32 %v1498_v26, %v1490_v16  ;;  %v1611_v42 = vadd.f32 %v1499_v28, %v1491_v17  ;;  %v1612_v43 = vadd.f32 %v1500_v29, %v1492_v18 }
  0x51   : > { %v1613_v44 = vadd.f32 %v1501_v30, %v1493_v20  ;;  %v1762_v45 = vrot.slane %v1606_v32, %v2571_v15  ;;  %v1766_v46 = vrot.slane %v1607_v33, %v2571_v15  ;;  %v1770_v47 = vrot.slane %v1608_v34, %v2571_v15 }
  0x52   : > { %v1774_v49 = vrot.slane %v1609_v40, %v2571_v15  ;;  %v1778_v50 = vrot.slane %v1610_v41, %v2571_v15  ;;  %v1782_v51 = vrot.slane %v1611_v42, %v2571_v15  ;;  %v1786_v52 = vrot.slane %v1612_v43, %v2571_v15 }
  0x53   : > { %v1790_v54 = vrot.slane %v1613_v44, %v2571_v15  ;;  %v1997_v55 = vsel %vm1983_vm1, %v1766_v46, %v1762_v45  ;;  %v339_v56 = vadd.f32 %v2562_v7, %v2667_v23  ;;  %v340_v57 = vadd.f32 %v2562_v7, %v2673_v27 }
  0x54   : > { %v1998_v58 = vsel %vm1985_vm2, %v1770_v47, %v1997_v55  ;;  %v341_v59 = vadd.f32 %v2562_v7, %v2677_v31  ;;  %v370_v60 = vmax.f32 %v2681_v36, 0.0  ;;  %v2713_v35 = vmul.f32 %v2552_v4, %v248_v48 }
  0x55   : > { %v1999_v61 = vsel %vm1987_vm3, %v1774_v49, %v1998_v58  ;;  %v371_v37 = vmax.f32 %v339_v56, 0.0  ;;  %v372_v62 = vmax.f32 %v340_v57, 0.0  ;;  %v2717_v63 = vmul.f32 %v2552_v4, %v249_v53 }
  0x56   : > { %v2000_v23 = vsel %vm1989_vm4, %v1778_v50, %v1999_v61  ;;  %v373_v27 = vmax.f32 %v341_v59, 0.0  ;;  %v754_v0 = vcombine.high %v370_v60, %v370_v60  ;;  %v761_v1 = vrot.slane %v370_v60, %v2576_v19 }
  0x57   : > { %v2001_v31 = vsel %vm1991_vm5, %v1782_v51, %v2000_v23  ;;  %v771_v38 = vcombine.high %v371_v37, %v371_v37  ;;  %v778_v36 = vrot.slane %v371_v37, %v2576_v19  ;;  %v788_v2 = vcombine.high %v372_v62, %v372_v62 }
  0x58   : > { %v2002_v3 = vsel %vm1993_vm6, %v1786_v52, %v2001_v31  ;;  %v768_v5 = vrot.slane %v754_v0, %v2576_v19  ;;  %v769_v39 = vcombine.high %v761_v1, %v761_v1  ;;  %v795_v6 = vrot.slane %v372_v62, %v2576_v19 }
  0x59   : > { %v2003_v8 = vsel %vm1995_vm7, %v1790_v54, %v2002_v3  ;;  %v785_v9 = vrot.slane %v771_v38, %v2576_v19  ;;  %v786_v10 = vcombine.high %v778_v36, %v778_v36  ;;  %v802_v11 = vrot.slane %v788_v2, %v2576_v19  ;;  %v251_v2 = vld [vmem:[%s2557_s26 + $0x58] sm:$0xff] }
  0x5a   : > { %2435 = vmatmul.mubr.msk.f32.vlgmr.msra.gmra.mrb[0].mxu0 %vm2046_vm8, %v2003_v8  ;;  %v770_v12 = vcombine.high %v768_v5, %v768_v5  ;;  %v803_v13 = vcombine.high %v795_v6, %v795_v6  ;;  %v805_v14 = vcombine.high %v373_v27, %v373_v27  ;;  %v812_v16 = vrot.slane %v373_v27, %v2576_v19  ;;  %v264_v8 = vld [vmem:[%s2557_s26 + $0xc0] sm:$0xff] }
  0x5b   : > { %v787_v17 = vcombine.high %v785_v9, %v785_v9  ;;  %v804_v18 = vcombine.high %v802_v11, %v802_v11  ;;  %v2362_v20 = vrot.slane %v761_v1, 9  ;;  %v2363_v21 = vrot.slane %v769_v39, 9 }
  0x5c   : > { %v819_v22 = vrot.slane %v805_v14, %v2576_v19  ;;  %v820_v24 = vcombine.high %v812_v16, %v812_v16  ;;  %v2364_v25 = vrot.slane %v768_v5, 9  ;;  %v2365_v26 = vrot.slane %v770_v12, 9 }
  0x5d   : > { %v2366_v28 = vrot.slane %v778_v36, 9  ;;  %v2367_v29 = vrot.slane %v786_v10, 9  ;;  %v2368_v30 = vrot.slane %v785_v9, 9  ;;  %v2369_v32 = vrot.slane %v787_v17, 9 }
  0x5e   : > { %v821_v33 = vcombine.high %v819_v22, %v819_v22  ;;  %v2370_v34 = vrot.slane %v795_v6, 9  ;;  %v2371_v40 = vrot.slane %v803_v13, 9  ;;  %v2372_v41 = vrot.slane %v802_v11, 9 }
  0x5f   : > { %v2373_v42 = vrot.slane %v804_v18, 9  ;;  %v2374_v43 = vrot.slane %v812_v16, 9  ;;  %v2375_v44 = vrot.slane %v820_v24, 9  ;;  %v2376_v45 = vrot.slane %v819_v22, 9 }
  0x60   : > { %v2377_v46 = vrot.slane %v821_v33, 9  ;;  %v1550_v47 = vadd.f32 %v2362_v20, %v761_v1  ;;  %v1551_v48 = vadd.f32 %v2363_v21, %v769_v39  ;;  %v1552_v49 = vadd.f32 %v2364_v25, %v768_v5  ;;  %v266_v20 = vld [vmem:[%s2557_s26 + $0xd0] sm:$0xff]  ;;  %v267_v25 = vld [vmem:[%s2557_s26 + $0xd8] sm:$0xff] }
  0x61   : > { %v1553_v50 = vadd.f32 %v2365_v26, %v770_v12  ;;  %v1554_v51 = vadd.f32 %v2366_v28, %v778_v36  ;;  %v1555_v52 = vadd.f32 %v2367_v29, %v786_v10  ;;  %v1556_v53 = vadd.f32 %v2368_v30, %v785_v9  ;;  %v250_v36 = vld [vmem:[%s2557_s26 + $0x50] sm:$0xff] }
  0x62   : > { %v1557_v54 = vadd.f32 %v2369_v32, %v787_v17  ;;  %v1558_v55 = vadd.f32 %v2370_v34, %v795_v6  ;;  %v1559_v56 = vadd.f32 %v2371_v40, %v803_v13  ;;  %v1560_v57 = vadd.f32 %v2372_v41, %v802_v11  ;;  %v265_v13 = vld [vmem:[%s2557_s26 + $0xc8] sm:$0xff] }
  0x63   : > { %v1561_v58 = vadd.f32 %v2373_v42, %v804_v18  ;;  %v1562_v59 = vadd.f32 %v2374_v43, %v812_v16  ;;  %v1563_v60 = vadd.f32 %v2375_v44, %v820_v24  ;;  %v1564_v61 = vadd.f32 %v2376_v45, %v819_v22 }
  0x64   : > { %v1565_v37 = vadd.f32 %v2377_v46, %v821_v33  ;;  %v1638_v62 = vadd.f32 %v1558_v55, %v1550_v47  ;;  %v1639_v23 = vadd.f32 %v1559_v56, %v1551_v48  ;;  %v1640_v27 = vadd.f32 %v1560_v57, %v1552_v49 }
  0x65   : > { %v1641_v0 = vadd.f32 %v1561_v58, %v1553_v50  ;;  %v1642_v1 = vadd.f32 %v1562_v59, %v1554_v51  ;;  %v1643_v31 = vadd.f32 %v1563_v60, %v1555_v52  ;;  %v1644_v38 = vadd.f32 %v1564_v61, %v1556_v53 }
  0x66   : > { %v1645_v3 = vadd.f32 %v1565_v37, %v1557_v54  ;;  %v1890_v5 = vrot.slane %v1638_v62, %v2571_v15  ;;  %v1894_v39 = vrot.slane %v1639_v23, %v2571_v15  ;;  %v1898_v6 = vrot.slane %v1640_v27, %v2571_v15 }
  0x67   : > { %v1902_v9 = vrot.slane %v1641_v0, %v2571_v15  ;;  %v1906_v10 = vrot.slane %v1642_v1, %v2571_v15  ;;  %v1910_v11 = vrot.slane %v1643_v31, %v2571_v15  ;;  %v1914_v12 = vrot.slane %v1644_v38, %v2571_v15 }
  0x68   : > { %v1918_v14 = vrot.slane %v1645_v3, %v2571_v15  ;;  %v2025_v16 = vsel %vm1983_vm1, %v1894_v39, %v1890_v5  ;;  %v289_v17 = vmul.f32 %v2552_v4, %v250_v36  ;;  %v290_v18 = vmul.f32 %v2552_v4, %v251_v2 }
  0x69   : > { %v2026_v21 = vsel %vm1985_vm2, %v1898_v6, %v2025_v16  ;;  %v326_v22 = vadd.f32 %v2562_v7, %v2713_v35  ;;  %v327_v24 = vadd.f32 %v2562_v7, %v2717_v63  ;;  %v2755_v26 = vmul.f32 %v2552_v4, %v264_v8 }
  0x6a   : > { %v2027_v28 = vsel %vm1987_vm3, %v1902_v9, %v2026_v21  ;;  %v328_v29 = vadd.f32 %v2562_v7, %v289_v17  ;;  %v329_v30 = vadd.f32 %v2562_v7, %v290_v18  ;;  %v2761_v32 = vmul.f32 %v2552_v4, %v265_v13 }
  0x6b   : > { %v2028_v33 = vsel %vm1989_vm4, %v1906_v10, %v2027_v28  ;;  %v358_v34 = vmax.f32 %v326_v22, 0.0  ;;  %v359_v35 = vmax.f32 %v327_v24, 0.0  ;;  %v2765_v40 = vmul.f32 %v2552_v4, %v266_v20 }
  0x6c   : > { %v2029_v63 = vsel %vm1991_vm5, %v1910_v11, %v2028_v33  ;;  %v360_v41 = vmax.f32 %v328_v29, 0.0  ;;  %v361_v42 = vmax.f32 %v329_v30, 0.0  ;;  %v2769_v43 = vmul.f32 %v2552_v4, %v267_v25 }
  0x6d   : > { %v2030_v44 = vsel %vm1993_vm6, %v1914_v12, %v2029_v63  ;;  %v550_v45 = vcombine.high %v358_v34, %v358_v34  ;;  %v557_v46 = vrot.slane %v358_v34, %v2576_v19  ;;  %v567_v47 = vcombine.high %v359_v35, %v359_v35 }
  0x6e   : > { %v2031_v48 = vsel %vm1995_vm7, %v1918_v14, %v2030_v44  ;;  %v574_v49 = vrot.slane %v359_v35, %v2576_v19  ;;  %v584_v50 = vcombine.high %v360_v41, %v360_v41  ;;  %v591_v51 = vrot.slane %v360_v41, %v2576_v19 }
  0x6f   : > { %2441 = vmatmul.mubr.msk.f32.vlgmr.msra.gmra.mrb[0].mxu1 %vm2046_vm8, %v2031_v48  ;;  %v564_v52 = vrot.slane %v550_v45, %v2576_v19  ;;  %v565_v53 = vcombine.high %v557_v46, %v557_v46  ;;  %v581_v54 = vrot.slane %v567_v47, %v2576_v19  ;;  %v601_v55 = vcombine.high %v361_v42, %v361_v42 }
  0x70   : > { %v582_v56 = vcombine.high %v574_v49, %v574_v49  ;;  %v598_v57 = vrot.slane %v584_v50, %v2576_v19  ;;  %v599_v58 = vcombine.high %v591_v51, %v591_v51  ;;  %v608_v59 = vrot.slane %v361_v42, %v2576_v19 }
  0x71   : > { %v566_v60 = vcombine.high %v564_v52, %v564_v52  ;;  %v583_v61 = vcombine.high %v581_v54, %v581_v54  ;;  %v615_v37 = vrot.slane %v601_v55, %v2576_v19  ;;  %v2314_v62 = vrot.slane %v557_v46, 9 }
  0x72   : > { %v600_v23 = vcombine.high %v598_v57, %v598_v57  ;;  %v616_v27 = vcombine.high %v608_v59, %v608_v59  ;;  %v2315_v0 = vrot.slane %v565_v53, 9  ;;  %v2316_v1 = vrot.slane %v564_v52, 9 }
  0x73   : > { %v617_v31 = vcombine.high %v615_v37, %v615_v37  ;;  %v2317_v38 = vrot.slane %v566_v60, 9  ;;  %v2318_v36 = vrot.slane %v574_v49, 9  ;;  %v2319_v2 = vrot.slane %v582_v56, 9 }
  0x74   : > { %v2320_v3 = vrot.slane %v581_v54, 9  ;;  %v2321_v5 = vrot.slane %v583_v61, 9  ;;  %v2322_v39 = vrot.slane %v591_v51, 9  ;;  %v2323_v6 = vrot.slane %v599_v58, 9 }
  0x75   : > { %v2324_v8 = vrot.slane %v598_v57, 9  ;;  %v2325_v9 = vrot.slane %v600_v23, 9  ;;  %v2326_v10 = vrot.slane %v608_v59, 9  ;;  %v2327_v11 = vrot.slane %v616_v27, 9 }
  0x76   : > { %v2328_v12 = vrot.slane %v615_v37, 9  ;;  %v2329_v13 = vrot.slane %v617_v31, 9  ;;  %v1502_v14 = vadd.f32 %v2314_v62, %v557_v46  ;;  %v1503_v16 = vadd.f32 %v2315_v0, %v565_v53  ;;  %v254_v0 = vld [vmem:[%s2557_s26 + $0x70] sm:$0xff] }
  0x77   : > { %v1504_v17 = vadd.f32 %v2316_v1, %v564_v52  ;;  %v1505_v18 = vadd.f32 %v2317_v38, %v566_v60  ;;  %v1506_v20 = vadd.f32 %v2318_v36, %v574_v49  ;;  %v1507_v21 = vadd.f32 %v2319_v2, %v582_v56  ;;  %v252_v56 = vld [vmem:[%s2557_s26 + $0x60] sm:$0xff] }
  0x78   : > { %v1508_v22 = vadd.f32 %v2320_v3, %v581_v54  ;;  %v1509_v24 = vadd.f32 %v2321_v5, %v583_v61  ;;  %v1510_v25 = vadd.f32 %v2322_v39, %v591_v51  ;;  %v1511_v28 = vadd.f32 %v2323_v6, %v599_v58 }
  0x79   : > { %v1512_v29 = vadd.f32 %v2324_v8, %v598_v57  ;;  %v1513_v30 = vadd.f32 %v2325_v9, %v600_v23  ;;  %v1514_v33 = vadd.f32 %v2326_v10, %v608_v59  ;;  %v1515_v34 = vadd.f32 %v2327_v11, %v616_v27  ;;  %v253_v57 = vld [vmem:[%s2557_s26 + $0x68] sm:$0xff] }
  0x7a   : > { %v1516_v35 = vadd.f32 %v2328_v12, %v615_v37  ;;  %v1517_v63 = vadd.f32 %v2329_v13, %v617_v31  ;;  %v1614_v41 = vadd.f32 %v1510_v25, %v1502_v14  ;;  %v1615_v42 = vadd.f32 %v1511_v28, %v1503_v16 }
  0x7b   : > { %v1616_v44 = vadd.f32 %v1512_v29, %v1504_v17  ;;  %v1617_v45 = vadd.f32 %v1513_v30, %v1505_v18  ;;  %v1618_v46 = vadd.f32 %v1514_v33, %v1506_v20  ;;  %v1619_v47 = vadd.f32 %v1515_v34, %v1507_v21 }
  0x7c   : > { %v1620_v48 = vadd.f32 %v1516_v35, %v1508_v22  ;;  %v1621_v49 = vadd.f32 %v1517_v63, %v1509_v24  ;;  %v1794_v50 = vrot.slane %v1614_v41, %v2571_v15  ;;  %v1798_v51 = vrot.slane %v1615_v42, %v2571_v15 }
  0x7d   : > { %v1802_v52 = vrot.slane %v1616_v44, %v2571_v15  ;;  %v1806_v53 = vrot.slane %v1617_v45, %v2571_v15  ;;  %v1810_v54 = vrot.slane %v1618_v46, %v2571_v15  ;;  %v1814_v55 = vrot.slane %v1619_v47, %v2571_v15 }
  0x7e   : > { %v1818_v58 = vrot.slane %v1620_v48, %v2571_v15  ;;  %v1822_v59 = vrot.slane %v1621_v49, %v2571_v15  ;;  %v2004_v60 = vsel %vm1983_vm1, %v1798_v51, %v1794_v50  ;;  %v342_v61 = vadd.f32 %v2562_v7, %v2755_v26 }
  0x7f   : > { %v2005_v37 = vsel %vm1985_vm2, %v1802_v52, %v2004_v60  ;;  %v343_v62 = vadd.f32 %v2562_v7, %v2761_v32  ;;  %v344_v23 = vadd.f32 %v2562_v7, %v2765_v40  ;;  %v345_v27 = vadd.f32 %v2562_v7, %v2769_v43 }
  0x80   : > { %v2006_v1 = vsel %vm1987_vm3, %v1806_v53, %v2005_v37  ;;  %v374_v31 = vmax.f32 %v342_v61, 0.0  ;;  %v2805_v38 = vmul.f32 %v2552_v4, %v252_v56  ;;  %v2808_v26 = vmul.f32 %v2552_v4, %v253_v57 }
  0x81   : > { %v2007_v36 = vsel %vm1989_vm4, %v1810_v54, %v2006_v1  ;;  %v375_v2 = vmax.f32 %v343_v62, 0.0  ;;  %v376_v32 = vmax.f32 %v344_v23, 0.0  ;;  %v377_v3 = vmax.f32 %v345_v27, 0.0 }
  0x82   : > { %v2008_v40 = vsel %vm1991_vm5, %v1814_v55, %v2007_v36  ;;  %v822_v5 = vcombine.high %v374_v31, %v374_v31  ;;  %v829_v7 = vrot.slane %v374_v31, %v2576_v19  ;;  %v2814_v43 = vmul.f32 %v2552_v4, %v254_v0 }
  0x83   : > { %v2009_v39 = vsel %vm1993_vm6, %v1818_v58, %v2008_v40  ;;  %v839_v6 = vcombine.high %v375_v2, %v375_v2  ;;  %v846_v8 = vrot.slane %v375_v2, %v2576_v19  ;;  %v856_v9 = vcombine.high %v376_v32, %v376_v32 }
  0x84   : > { %v2010_v10 = vsel %vm1995_vm7, %v1822_v59, %v2009_v39  ;;  %v836_v11 = vrot.slane %v822_v5, %v2576_v19  ;;  %v837_v12 = vcombine.high %v829_v7, %v829_v7  ;;  %v863_v13 = vrot.slane %v376_v32, %v2576_v19 }
  0x85   : > { %2437 = vmatprep.mubr.msk.f32.mxu0 %vm2046_vm8, %v2010_v10  ;;  %v853_v14 = vrot.slane %v839_v6, %v2576_v19  ;;  %v854_v16 = vcombine.high %v846_v8, %v846_v8  ;;  %v870_v4 = vrot.slane %v856_v9, %v2576_v19  ;;  %v873_v17 = vcombine.high %v377_v3, %v377_v3  ;;  %v255_v6 = vld [vmem:[%s2557_s26 + $0x78] sm:$0xff] }
  0x86   : > { %v838_v18 = vcombine.high %v836_v11, %v836_v11  ;;  %v871_v20 = vcombine.high %v863_v13, %v863_v13  ;;  %v880_v21 = vrot.slane %v377_v3, %v2576_v19  ;;  %v2378_v22 = vrot.slane %v829_v7, 9 }
  0x87   : > { %v855_v24 = vcombine.high %v853_v14, %v853_v14  ;;  %v872_v25 = vcombine.high %v870_v4, %v870_v4  ;;  %v887_v28 = vrot.slane %v873_v17, %v2576_v19  ;;  %v2379_v29 = vrot.slane %v837_v12, 9 }
  0x88   : > { %v888_v30 = vcombine.high %v880_v21, %v880_v21  ;;  %v2380_v33 = vrot.slane %v836_v11, 9  ;;  %v2381_v34 = vrot.slane %v838_v18, 9  ;;  %v2382_v35 = vrot.slane %v846_v8, 9 }
  0x89   : > { %v889_v63 = vcombine.high %v887_v28, %v887_v28  ;;  %v2383_v41 = vrot.slane %v854_v16, 9  ;;  %v2384_v42 = vrot.slane %v853_v14, 9  ;;  %v2385_v44 = vrot.slane %v855_v24, 9 }
  0x8a   : > { %v2386_v45 = vrot.slane %v863_v13, 9  ;;  %v2387_v46 = vrot.slane %v871_v20, 9  ;;  %v2388_v47 = vrot.slane %v870_v4, 9  ;;  %v2389_v48 = vrot.slane %v872_v25, 9 }
  0x8b   : > { %v2390_v49 = vrot.slane %v880_v21, 9  ;;  %v2391_v50 = vrot.slane %v888_v30, 9  ;;  %v2392_v51 = vrot.slane %v887_v28, 9  ;;  %v2393_v52 = vrot.slane %v889_v63, 9 }
  0x8c   : > { %v1566_v53 = vadd.f32 %v2378_v22, %v829_v7  ;;  %v1567_v54 = vadd.f32 %v2379_v29, %v837_v12  ;;  %v1568_v55 = vadd.f32 %v2380_v33, %v836_v11  ;;  %v1569_v56 = vadd.f32 %v2381_v34, %v838_v18  ;;  %v268_v12 = vld [vmem:[%s2557_s26 + $0xe0] sm:$0xff]  ;;  %v271_v29 = vld [vmem:[%s2557_s26 + $0xf8] sm:$0xff] }
  0x8d   : > { %v1570_v57 = vadd.f32 %v2382_v35, %v846_v8  ;;  %v1571_v58 = vadd.f32 %v2383_v41, %v854_v16  ;;  %v1572_v59 = vadd.f32 %v2384_v42, %v853_v14  ;;  %v1573_v60 = vadd.f32 %v2385_v44, %v855_v24  ;;  %v2844_v22 = vld [vmem:[%s2949_s2] ss:$0 sm:$0xff] }
  0x8e   : > { %v1574_v61 = vadd.f32 %v2386_v45, %v863_v13  ;;  %v1575_v37 = vadd.f32 %v2387_v46, %v871_v20  ;;  %v1576_v62 = vadd.f32 %v2388_v47, %v870_v4  ;;  %v1577_v23 = vadd.f32 %v2389_v48, %v872_v25  ;;  %v269_v13 = vld [vmem:[%s2557_s26 + $0xe8] sm:$0xff]  ;;  %v2473_v20 = vld [vmem:[%s2948_s1] ss:$0 sm:$0xff] }
  0x8f   : > { %v1578_v27 = vadd.f32 %v2390_v49, %v880_v21  ;;  %v1579_v0 = vadd.f32 %v2391_v50, %v888_v30  ;;  %v1580_v1 = vadd.f32 %v2392_v51, %v887_v28  ;;  %v1581_v31 = vadd.f32 %v2393_v52, %v889_v63  ;;  %v270_v28 = vld [vmem:[%s2557_s26 + $0xf0] sm:$0xff] }
  0x90   : > { %v1646_v36 = vadd.f32 %v1574_v61, %v1566_v53  ;;  %v1647_v2 = vadd.f32 %v1575_v37, %v1567_v54  ;;  %v1648_v32 = vadd.f32 %v1576_v62, %v1568_v55  ;;  %v1649_v3 = vadd.f32 %v1577_v23, %v1569_v56 }
  0x91   : > { %v1650_v40 = vadd.f32 %v1578_v27, %v1570_v57  ;;  %v1651_v5 = vadd.f32 %v1579_v0, %v1571_v58  ;;  %v1652_v7 = vadd.f32 %v1580_v1, %v1572_v59  ;;  %v1653_v39 = vadd.f32 %v1581_v31, %v1573_v60 }
  0x92   : > { %v1922_v8 = vrot.slane %v1646_v36, %v2571_v15  ;;  %v1926_v9 = vrot.slane %v1647_v2, %v2571_v15  ;;  %v1930_v10 = vrot.slane %v1648_v32, %v2571_v15  ;;  %v1934_v11 = vrot.slane %v1649_v3, %v2571_v15 }
  0x93   : > { %v1938_v14 = vrot.slane %v1650_v40, %v2571_v15  ;;  %v1942_v16 = vrot.slane %v1651_v5, %v2571_v15  ;;  %v1946_v4 = vrot.slane %v1652_v7, %v2571_v15  ;;  %v1950_v17 = vrot.slane %v1653_v39, %v2571_v15 }
  0x94   : > { %v2032_v18 = vsel %vm1983_vm1, %v1926_v9, %v1922_v8  ;;  %v294_v21 = vmul.f32 %v2473_v20, %v255_v6  ;;  %v330_v24 = vadd.f32 %v2844_v22, %v2805_v38  ;;  %v331_v25 = vadd.f32 %v2844_v22, %v2808_v26 }
  0x95   : > { %v2033_v30 = vsel %vm1985_vm2, %v1930_v10, %v2032_v18  ;;  %v332_v33 = vadd.f32 %v2844_v22, %v2814_v43  ;;  %v2855_v34 = vmul.f32 %v2473_v20, %v268_v12  ;;  %v2857_v35 = vmul.f32 %v2473_v20, %v269_v13 }
  0x96   : > { %v2034_v63 = vsel %vm1987_vm3, %v1934_v11, %v2033_v30  ;;  %v333_v41 = vadd.f32 %v2844_v22, %v294_v21  ;;  %v362_v42 = vmax.f32 %v330_v24, 0.0  ;;  %v363_v38 = vmax.f32 %v331_v25, 0.0 }
  0x97   : > { %v2035_v44 = vsel %vm1989_vm4, %v1938_v14, %v2034_v63  ;;  %v364_v26 = vmax.f32 %v332_v33, 0.0  ;;  %v2862_v45 = vmul.f32 %v2473_v20, %v270_v28  ;;  %v2864_v46 = vmul.f32 %v2473_v20, %v271_v29 }
  0x98   : > { %v2036_v47 = vsel %vm1991_vm5, %v1942_v16, %v2035_v44  ;;  %v365_v43 = vmax.f32 %v333_v41, 0.0  ;;  %v618_v48 = vcombine.high %v362_v42, %v362_v42  ;;  %v625_v49 = vrot.slane %v362_v42, %v2576_v19 }
  0x99   : > { %v2037_v50 = vsel %vm1993_vm6, %v1946_v4, %v2036_v47  ;;  %v635_v51 = vcombine.high %v363_v38, %v363_v38  ;;  %v642_v52 = vrot.slane %v363_v38, %v2576_v19  ;;  %v652_v53 = vcombine.high %v364_v26, %v364_v26 }
  0x9a   : > { %v2038_v54 = vsel %vm1995_vm7, %v1950_v17, %v2037_v50  ;;  %v632_v55 = vrot.slane %v618_v48, %v2576_v19  ;;  %v633_v56 = vcombine.high %v625_v49, %v625_v49  ;;  %v659_v57 = vrot.slane %v364_v26, %v2576_v19 }
  0x9b   : > { %2443 = vmatprep.mubr.msk.f32.mxu1 %vm2046_vm8, %v2038_v54  ;;  %v649_v58 = vrot.slane %v635_v51, %v2576_v19  ;;  %v650_v59 = vcombine.high %v642_v52, %v642_v52  ;;  %v666_v60 = vrot.slane %v652_v53, %v2576_v19  ;;  %v669_v61 = vcombine.high %v365_v43, %v365_v43 }
  0x9c   : > { %v634_v37 = vcombine.high %v632_v55, %v632_v55  ;;  %v667_v62 = vcombine.high %v659_v57, %v659_v57  ;;  %v676_v23 = vrot.slane %v365_v43, %v2576_v19  ;;  %v2330_v27 = vrot.slane %v625_v49, 9 }
  0x9d   : > { %v651_v0 = vcombine.high %v649_v58, %v649_v58  ;;  %v668_v1 = vcombine.high %v666_v60, %v666_v60  ;;  %v683_v31 = vrot.slane %v669_v61, %v2576_v19  ;;  %v2331_v36 = vrot.slane %v633_v56, 9 }
  0x9e   : > { %v684_v2 = vcombine.high %v676_v23, %v676_v23  ;;  %v2332_v32 = vrot.slane %v632_v55, 9  ;;  %v2333_v3 = vrot.slane %v634_v37, 9  ;;  %v2334_v40 = vrot.slane %v642_v52, 9 }
  0x9f   : > { %v685_v5 = vcombine.high %v683_v31, %v683_v31  ;;  %v2335_v7 = vrot.slane %v650_v59, 9  ;;  %v2336_v39 = vrot.slane %v649_v58, 9  ;;  %v2337_v6 = vrot.slane %v651_v0, 9 }
  0xa0   : > { %v2338_v8 = vrot.slane %v659_v57, 9  ;;  %v2339_v9 = vrot.slane %v667_v62, 9  ;;  %v2340_v10 = vrot.slane %v666_v60, 9  ;;  %v2341_v11 = vrot.slane %v668_v1, 9 }
  0xa1   : > { %v2342_v12 = vrot.slane %v676_v23, 9  ;;  %v2343_v13 = vrot.slane %v684_v2, 9  ;;  %v2344_v14 = vrot.slane %v683_v31, 9  ;;  %v2345_v16 = vrot.slane %v685_v5, 9 }
  0xa2   : > { %v1518_v4 = vadd.f32 %v2330_v27, %v625_v49  ;;  %v1519_v17 = vadd.f32 %v2331_v36, %v633_v56  ;;  %v1520_v18 = vadd.f32 %v2332_v32, %v632_v55  ;;  %v1521_v20 = vadd.f32 %v2333_v3, %v634_v37 }
  0xa3   : > { %v1522_v21 = vadd.f32 %v2334_v40, %v642_v52  ;;  %v1523_v24 = vadd.f32 %v2335_v7, %v650_v59  ;;  %v1524_v25 = vadd.f32 %v2336_v39, %v649_v58  ;;  %v1525_v28 = vadd.f32 %v2337_v6, %v651_v0 }
  0xa4   : > { %v1526_v29 = vadd.f32 %v2338_v8, %v659_v57  ;;  %v1527_v30 = vadd.f32 %v2339_v9, %v667_v62  ;;  %v1528_v33 = vadd.f32 %v2340_v10, %v666_v60  ;;  %v1529_v63 = vadd.f32 %v2341_v11, %v668_v1 }
  0xa5   : > { %v1530_v41 = vadd.f32 %v2342_v12, %v676_v23  ;;  %v1531_v42 = vadd.f32 %v2343_v13, %v684_v2  ;;  %v1532_v38 = vadd.f32 %v2344_v14, %v683_v31  ;;  %v1533_v44 = vadd.f32 %v2345_v16, %v685_v5 }
  0xa6   : > { %v1622_v26 = vadd.f32 %v1526_v29, %v1518_v4  ;;  %v1623_v47 = vadd.f32 %v1527_v30, %v1519_v17  ;;  %v1624_v43 = vadd.f32 %v1528_v33, %v1520_v18  ;;  %v1625_v48 = vadd.f32 %v1529_v63, %v1521_v20 }
  0xa7   : > { %v1626_v49 = vadd.f32 %v1530_v41, %v1522_v21  ;;  %v1627_v50 = vadd.f32 %v1531_v42, %v1523_v24  ;;  %v1628_v51 = vadd.f32 %v1532_v38, %v1524_v25  ;;  %v1629_v53 = vadd.f32 %v1533_v44, %v1525_v28 }
  0xa8   : > { %v1826_v52 = vrot.slane %v1622_v26, %v2571_v15  ;;  %v1830_v54 = vrot.slane %v1623_v47, %v2571_v15  ;;  %v1834_v55 = vrot.slane %v1624_v43, %v2571_v15  ;;  %v1838_v56 = vrot.slane %v1625_v48, %v2571_v15 }
  0xa9   : > { %v1842_v57 = vrot.slane %v1626_v49, %v2571_v15  ;;  %v1846_v58 = vrot.slane %v1627_v50, %v2571_v15  ;;  %v346_v60 = vadd.f32 %v2844_v22, %v2855_v34  ;;  %v347_v61 = vadd.f32 %v2844_v22, %v2857_v35 }
  0xaa   : > { %v2011_v59 = vsel %vm1983_vm1, %v1830_v54, %v1826_v52  ;;  %v348_v37 = vadd.f32 %v2844_v22, %v2862_v45  ;;  %v1850_v62 = vrot.slane %v1628_v51, %v2571_v15  ;;  %v1854_v23 = vrot.slane %v1629_v53, %v2571_v15 }
  0xab   : > { %v2012_v27 = vsel %vm1985_vm2, %v1834_v55, %v2011_v59  ;;  %v349_v0 = vadd.f32 %v2844_v22, %v2864_v46  ;;  %v378_v31 = vmax.f32 %v346_v60, 0.0  ;;  %v379_v36 = vmax.f32 %v347_v61, 0.0 }
  0xac   : > { %v2013_v1 = vsel %vm1987_vm3, %v1838_v56, %v2012_v27  ;;  %v380_v34 = vmax.f32 %v348_v37, 0.0 }
  0xad   : > { %v2014_v2 = vsel %vm1989_vm4, %v1842_v57, %v2013_v1  ;;  %v381_v35 = vmax.f32 %v349_v0, 0.0  ;;  %v890_v45 = vcombine.high %v378_v31, %v378_v31  ;;  %v897_v3 = vrot.slane %v378_v31, %v2576_v19 }
  0xae   : > { %v2015_v32 = vsel %vm1991_vm5, %v1846_v58, %v2014_v2  ;;  %v907_v40 = vcombine.high %v379_v36, %v379_v36  ;;  %v914_v7 = vrot.slane %v379_v36, %v2576_v19  ;;  %v924_v39 = vcombine.high %v380_v34, %v380_v34 }
  0xaf   : > { %v2016_v5 = vsel %vm1993_vm6, %v1850_v62, %v2015_v32  ;;  %v931_v22 = vrot.slane %v380_v34, %v2576_v19  ;;  %v904_v6 = vrot.slane %v890_v45, %v2576_v19  ;;  %v905_v8 = vcombine.high %v897_v3, %v897_v3 }
  0xb0   : > { %v2017_v46 = vsel %vm1995_vm7, %v1854_v23, %v2016_v5  ;;  %v921_v9 = vrot.slane %v907_v40, %v2576_v19  ;;  %v922_v10 = vcombine.high %v914_v7, %v914_v7  ;;  %v938_v11 = vrot.slane %v924_v39, %v2576_v19 }
  0xb1   : > { %2438 = vmatmul.mubr.msk.f32.gmra.mrb[2].mxu0 %vm2046_vm8, %v2017_v46  ;;  %v939_v12 = vcombine.high %v931_v22, %v931_v22  ;;  %v941_v13 = vcombine.high %v381_v35, %v381_v35  ;;  %v906_v14 = vcombine.high %v904_v6, %v904_v6  ;;  %v948_v4 = vrot.slane %v381_v35, %v2576_v19 }
  0xb2   : > { %v923_v16 = vcombine.high %v921_v9, %v921_v9  ;;  %v2394_v17 = vrot.slane %v897_v3, 9  ;;  %v940_v18 = vcombine.high %v938_v11, %v938_v11  ;;  %v2395_v21 = vrot.slane %v905_v8, 9 }
  0xb3   : > { %v955_v20 = vrot.slane %v941_v13, %v2576_v19  ;;  %v2396_v24 = vrot.slane %v904_v6, 9  ;;  %v956_v25 = vcombine.high %v948_v4, %v948_v4  ;;  %v2397_v28 = vrot.slane %v906_v14, 9 }
  0xb4   : > { %v2398_v29 = vrot.slane %v914_v7, 9  ;;  %v2399_v30 = vrot.slane %v922_v10, 9  ;;  %v2400_v63 = vrot.slane %v921_v9, 9  ;;  %v2401_v41 = vrot.slane %v923_v16, 9 }
  0xb5   : > { %v957_v33 = vcombine.high %v955_v20, %v955_v20  ;;  %v2402_v42 = vrot.slane %v931_v22, 9  ;;  %v2403_v38 = vrot.slane %v939_v12, 9  ;;  %v2404_v44 = vrot.slane %v938_v11, 9 }
  0xb6   : > { %v2405_v26 = vrot.slane %v940_v18, 9  ;;  %v2406_v47 = vrot.slane %v948_v4, 9  ;;  %v2407_v43 = vrot.slane %v956_v25, 9  ;;  %v2408_v48 = vrot.slane %v955_v20, 9 }
  0xb7   : > { %v2409_v49 = vrot.slane %v957_v33, 9  ;;  %v1582_v50 = vadd.f32 %v2394_v17, %v897_v3  ;;  %v1583_v51 = vadd.f32 %v2395_v21, %v905_v8  ;;  %v1584_v19 = vadd.f32 %v2396_v24, %v904_v6 }
  0xb8   : > { %v1585_v53 = vadd.f32 %v2397_v28, %v906_v14  ;;  %v1586_v52 = vadd.f32 %v2398_v29, %v914_v7  ;;  %v1587_v54 = vadd.f32 %v2399_v30, %v922_v10  ;;  %v1588_v55 = vadd.f32 %v2400_v63, %v921_v9 }
  0xb9   : > { %v1589_v56 = vadd.f32 %v2401_v41, %v923_v16  ;;  %v1590_v57 = vadd.f32 %v2402_v42, %v931_v22  ;;  %v1591_v58 = vadd.f32 %v2403_v38, %v939_v12  ;;  %v1592_v59 = vadd.f32 %v2404_v44, %v938_v11 }
  0xba   : > { %v1593_v60 = vadd.f32 %v2405_v26, %v940_v18  ;;  %v1594_v61 = vadd.f32 %v2406_v47, %v948_v4  ;;  %v1595_v37 = vadd.f32 %v2407_v43, %v956_v25  ;;  %v1596_v62 = vadd.f32 %v2408_v48, %v955_v20 }
  0xbb   : > { %v1597_v23 = vadd.f32 %v2409_v49, %v957_v33  ;;  %v1654_v27 = vadd.f32 %v1590_v57, %v1582_v50  ;;  %v1655_v0 = vadd.f32 %v1591_v58, %v1583_v51  ;;  %v1656_v1 = vadd.f32 %v1592_v59, %v1584_v19 }
  0xbc   : > { %v1657_v31 = vadd.f32 %v1593_v60, %v1585_v53  ;;  %v1658_v36 = vadd.f32 %v1594_v61, %v1586_v52  ;;  %v1659_v34 = vadd.f32 %v1595_v37, %v1587_v54  ;;  %v1660_v2 = vadd.f32 %v1596_v62, %v1588_v55 }
  0xbd   : > { %v1954_v35 = vrot.slane %v1654_v27, %v2571_v15  ;;  %v1661_v32 = vadd.f32 %v1597_v23, %v1589_v56  ;;  %v1958_v45 = vrot.slane %v1655_v0, %v2571_v15  ;;  %v1962_v3 = vrot.slane %v1656_v1, %v2571_v15 }
  0xbe   : > { %v1966_v40 = vrot.slane %v1657_v31, %v2571_v15  ;;  %v1970_v5 = vrot.slane %v1658_v36, %v2571_v15  ;;  %v1974_v7 = vrot.slane %v1659_v34, %v2571_v15  ;;  %v1978_v22 = vrot.slane %v1660_v2, %v2571_v15 }
  0xbf   : > { %v2039_v39 = vsel %vm1983_vm1, %v1958_v45, %v1954_v35  ;;  %v1982_v6 = vrot.slane %v1661_v32, %v2571_v15 }
  0xc0   : > { %v2040_v46 = vsel %vm1985_vm2, %v1962_v3, %v2039_v39 }
  0xc1   : > { %v2041_v8 = vsel %vm1987_vm3, %v1966_v40, %v2040_v46 }
  0xc2   : > { %v2042_v9 = vsel %vm1989_vm4, %v1970_v5, %v2041_v8 }
  0xc3   : > { %v2043_v10 = vsel %vm1991_vm5, %v1974_v7, %v2042_v9 }
  0xc4   : > { %v2044_v11 = vsel %vm1993_vm6, %v1978_v22, %v2043_v10 }
  0xc5   : > { %v2045_v12 = vsel %vm1995_vm7, %v1982_v6, %v2044_v11 }
  0xc6   : > { %2444 = vmatmul.mubr.msk.f32.gmra.mrb[2].mxu1 %vm2046_vm8, %v2045_v12 }
 0x12d   : > { %v2436_v13 = vpop.f32.mrb[0].mxu0 }
 0x12e   : > { %2174 = vst.msk [vmem:[%s238_s10 + $0x8] sm:$0xff] %vm2172_vm9, %v2436_v13  ;;  %v2133_v15 = vpop.f32.mrb[1].mxu0 }
 0x12f   : > { %2173 = vst.msk [vmem:[%s238_s10] sm:$0xff] %vm2172_vm9, %v2133_v15 }
 0x142   : > { %v2442_v14 = vpop.f32.mrb[0].mxu1 }
 0x143   : > { %2178 = vst.msk [vmem:[%s238_s10 + $0x28] sm:$0xff] %vm2172_vm9, %v2442_v14  ;;  %v2153_v16 = vpop.f32.mrb[1].mxu1 }
 0x144   : > { %2177 = vst.msk [vmem:[%s238_s10 + $0x20] sm:$0xff] %vm2172_vm9, %v2153_v16 }
 0x184   : > { %v2439_v4 = vpop.f32.mrb[2].mxu0 }
 0x185   : > { %2176 = vst.msk [vmem:[%s238_s10 + $0x18] sm:$0xff] %vm2172_vm9, %v2439_v4  ;;  %v2143_v17 = vpop.f32.mrb[3].mxu0 }
 0x186   : > { %2175 = vst.msk [vmem:[%s238_s10 + $0x10] sm:$0xff] %vm2172_vm9, %v2143_v17 }
 0x199   : > { %v2445_v18 = vpop.f32.mrb[2].mxu1 }
 0x19a   : > { %2180 = vst.msk [vmem:[%s238_s10 + $0x38] sm:$0xff] %vm2172_vm9, %v2445_v18  ;;  %v2163_v20 = vpop.f32.mrb[3].mxu1 }
 0x19b   : > { %2179 = vst.msk [vmem:[%s238_s10 + $0x30] sm:$0xff] %vm2172_vm9, %v2163_v20 }
 0x19c PF: > { %s14_s17 = sadd.s32 1, %s2497_s17   ;;  %s2952_s15 = smov %s2493_s16 }
 0x19d   : > { %p11_p5 = scmp.ge.s32.totalorder %s14_s17, 4   ;;  %s2953_s16 = smov %s2955_s18 }
 0x19f   :  { %13 = sbr.rel (!%p11_p5) target bundleno = 2 (0x2), region = 66 }

</bundles_post_ra>
